<compile_context>
chip_gen: v6e
topology: v6e:2x2x1
jax: 0.10.0
libtpu: 0.0.40
codegen_flags: <defaults>
</compile_context>

<pallas_src>
from math import log2

import numpy as np
import jax
import jax.numpy as jnp
from jax.experimental import pallas as pl
from jax.experimental.pallas import tpu as pltpu

N_FEATURES = 32
INP_DIM = 32
IMG_SIZE = 16
OUT_DIM = 3
MIN_FEATURES = 8
N_BLOCKS = int(log2(IMG_SIZE))          # 4
BATCH = 2

RGB_PAD = 8                             # rgb carried on 8 sublanes (Cout 3 -> 8)
Z_LANES = 8                             # latent batch lanes padded BATCH -> 8
PAD_LANES = 128                         # small stages lane-padded to one full lane tile
ROWS_FULL = BATCH * IMG_SIZE * IMG_SIZE  # 512
VMEM = pltpu.MemorySpace.VMEM


def _n_ch(i):
    return max(N_FEATURES // (2 ** i), MIN_FEATURES)


def _vmem_specs(n):
    return [pl.BlockSpec(memory_space=VMEM) for _ in range(n)]


# ---------------------------------------------------------------------------
# One-time pltpu.roll rotation-direction self-check (lane axis, matching the
# main kernel's usage).  The kernel always rolls by (-offset) % lanes; if the
# hardware rotate convention is mirrored, the host-side weight/mask packing
# compensates, so the main kernel is correct either way.
# ---------------------------------------------------------------------------
def _roll_probe_kernel(x_ref, o_ref):
    o_ref[...] = pltpu.roll(x_ref[...], shift=1, axis=1)


def detect_roll_matches_jnp():
    x = jnp.ones((8, 1), jnp.float32) * jnp.arange(128, dtype=jnp.float32)[None, :]
    y = pl.pallas_call(
        _roll_probe_kernel,
        out_shape=jax.ShapeDtypeStruct((8, 128), jnp.float32),
        in_specs=_vmem_specs(1),
        out_specs=pl.BlockSpec(memory_space=VMEM),
    )(x)
    # jnp.roll semantics => y[0, 1] == x[0, 0] == 0 ; mirrored => y[0, 1] == 2
    return float(np.asarray(y)[0, 1]) < 0.5


# ---------------------------------------------------------------------------
# Fused forward kernel (transposed layout: channels on sublanes, B*H*W on lanes)
# ---------------------------------------------------------------------------
def giraffe_kernel(z_ref,
                   rw0_ref, rb0_ref,
                   fw0_ref, fb0_ref, rw1_ref, rb1_ref,
                   fw1_ref, fb1_ref, rw2_ref, rb2_ref,
                   fw2_ref, fb2_ref, rw3_ref, rb3_ref,
                   fw3_ref, fb3_ref, rw4_ref, rb4_ref,
                   u1_ref, u2n_ref, u2b_ref, u4n_ref, u4b_ref, u8n_ref, u8b_ref,
                   m2_ref, m4_ref, m8_ref, m16_ref,
                   out_ref, col_ref):
    z = z_ref[...]                                            # (32, 8); lanes >= BATCH are zero

    def conv3x3(x, w_ref, b_ref, m_ref, width):
        """3x3 'same' conv: 9 lane-rotated + masked taps -> one K = 9*Cin MXU matmul."""
        cin, rows = x.shape
        for t in range(9):
            oy, ox = t // 3 - 1, t % 3 - 1
            s = oy * width + ox                               # flattened-lane offset of tap t
            shifted = x if s == 0 else pltpu.roll(x, shift=(-s) % rows, axis=1)
            col_ref[t * cin:(t + 1) * cin, 0:rows] = shifted * m_ref[t:t + 1, 0:rows]
        cols = col_ref[0:9 * cin, 0:rows]                     # (9*Cin, rows), lane-dense
        return jnp.dot(w_ref[...], cols, preferred_element_type=jnp.float32) + b_ref[...]

    def mm(a, b_ref):
        return jnp.dot(a, b_ref[...], preferred_element_type=jnp.float32)

    # rgb skip head at 1x1: a padded 3x3 conv on a single pixel is its centre tap.
    rgb = jnp.dot(rw0_ref[...], z, preferred_element_type=jnp.float32) + rb0_ref[...]  # (8, 8)
    rgb = mm(rgb, u1_ref)                                     # bilinear 1x1 -> 2x2   (8, 128)
    net = mm(z, u1_ref)                                       # nearest  1x1 -> 2x2   (32, 128)

    # block 0 @ 2x2  (valid lanes 0..7)
    net = jnp.maximum(conv3x3(net, fw0_ref, fb0_ref, m2_ref, 2), 0.0)     # (16, 128)
    rgb = rgb + conv3x3(net, rw1_ref, rb1_ref, m2_ref, 2)
    rgb = mm(rgb, u2b_ref)                                    # bilinear 2x2 -> 4x4   (8, 128)

    # block 1 @ 4x4  (valid lanes 0..31)
    net = mm(net, u2n_ref)                                    # nearest  2x2 -> 4x4   (16, 128)
    net = jnp.maximum(conv3x3(net, fw1_ref, fb1_ref, m4_ref, 4), 0.0)     # (8, 128)
    rgb = rgb + conv3x3(net, rw2_ref, rb2_ref, m4_ref, 4)
    rgb = mm(rgb, u4b_ref)                                    # bilinear 4x4 -> 8x8   (8, 128)

    # block 2 @ 8x8  (all 128 lanes valid)
    net = mm(net, u4n_ref)                                    # nearest  4x4 -> 8x8   (8, 128)
    net = jnp.maximum(conv3x3(net, fw2_ref, fb2_ref, m8_ref, 8), 0.0)
    rgb = rgb + conv3x3(net, rw3_ref, rb3_ref, m8_ref, 8)
    rgb = mm(rgb, u8b_ref)                                    # bilinear 8x8 -> 16x16 (8, 512)

    # block 3 @ 16x16 (512 lanes)
    net = mm(net, u8n_ref)                                    # nearest  8x8 -> 16x16 (8, 512)
    net = jnp.maximum(conv3x3(net, fw3_ref, fb3_ref, m16_ref, 16), 0.0)
    rgb = rgb + conv3x3(net, rw4_ref, rb4_ref, m16_ref, 16)

    out_ref[...] = jax.nn.sigmoid(rgb)                        # (8, 512) lane-dense store

# TODO(synk): InstanceNorm branch (use_norm=True) and milestone/step bookkeeping are
# training-time Python state, not part of the default forward pass; not implemented.


# ---------------------------------------------------------------------------
# Host-side constant packing (runs once; results stay device-resident)
# ---------------------------------------------------------------------------
def _up1d_matrix(n, mode):
    u = np.zeros((2 * n, n), np.float32)
    if mode == "nearest":                      # torch nn.Upsample(mode='nearest')
        for o in range(2 * n):
            u[o, o // 2] = 1.0
    else:                                      # 'bilinear', align_corners=False
        for o in range(2 * n):
            src = max((o + 0.5) / 2.0 - 0.5, 0.0)
            i0 = min(int(np.floor(src)), n - 1)
            i1 = min(i0 + 1, n - 1)
            w1 = src - i0
            u[o, i0] += 1.0 - w1
            u[o, i1] += w1
    return u


def _up2d_matrix(n, mode):
    u = _up1d_matrix(n, mode)
    return np.kron(u, u).astype(np.float32)    # (4n^2, n^2), row-major (Y,X)/(y,x)


def _block_diag_up_t(n, mode, rows_pad, cols_pad):
    """Transposed, batch-block-diagonal, lane-padded 2x upsample operator."""
    blk = _up2d_matrix(n, mode).T              # (n^2, 4n^2)
    out = np.zeros((rows_pad, cols_pad), np.float32)
    for b in range(BATCH):
        out[b * n * n:(b + 1) * n * n, b * 4 * n * n:(b + 1) * 4 * n * n] = blk
    return out


def _conv_masks_t(n, rows_pad, tap_order):
    """(16, rows_pad) per-tap validity mask (taps on sublanes, flattened rows on lanes):
    zero padding at image borders, no mixing across batch boundaries, zero beyond B*n*n."""
    m = np.zeros((16, rows_pad), np.float32)
    for t, p in enumerate(tap_order):
        oy, ox = p // 3 - 1, p % 3 - 1
        for b in range(BATCH):
            for y in range(n):
                for x in range(n):
                    if 0 <= y + oy < n and 0 <= x + ox < n:
                        m[t, b * n * n + y * n + x] = 1.0
    return m


def pack_constants(params, roll_matches_jnp):
    # If pltpu.roll rotates in the mirrored direction, im2col slot t receives the data
    # of tap 8-t; mirrored packing order compensates (kernel stays convention-free).
    tap_order = list(range(9)) if roll_matches_jnp else list(range(8, -1, -1))

    def pack_w(w, cout_pad):
        w = np.asarray(w, np.float32)                        # (3, 3, cin, cout)
        cin, cout = w.shape[2], w.shape[3]
        packed = np.zeros((cout_pad, 9 * cin), np.float32)
        for t, p in enumerate(tap_order):
            packed[:cout, t * cin:(t + 1) * cin] = w[p // 3, p % 3].T
        return packed

    def pack_b(b, cout_pad):
        b = np.asarray(b, np.float32)
        out = np.zeros((cout_pad, 1), np.float32)
        out[:b.shape[0], 0] = b
        return out

    fw = [pack_w(w, w.shape[3]) for w in params["feat_w"]]
    fb = [pack_b(b, b.shape[0]) for b in params["feat_b"]]
    rw = [pack_w(w, RGB_PAD) for w in params["rgb_w"]]
    rb = [pack_b(b, RGB_PAD) for b in params["rgb_b"]]
    # rgb head runs at 1x1 spatial: only the centre tap of its 3x3 kernel is ever used.
    w0 = np.asarray(params["rgb_w"][0], np.float32)
    rw0 = np.zeros((RGB_PAD, w0.shape[2]), np.float32)
    rw0[:OUT_DIM, :] = w0[1, 1].T

    # 2x upsampling operators (nearest for features, bilinear align_corners=False for rgb),
    # transposed and block-diagonal over batch, lane-padded to 128 where needed.
    u1 = np.zeros((Z_LANES, PAD_LANES), np.float32)          # 1x1 -> 2x2 (both modes replicate)
    for b in range(BATCH):
        u1[b, b * 4:(b + 1) * 4] = 1.0
    u2n = _block_diag_up_t(2, "nearest", PAD_LANES, PAD_LANES)
    u2b = _block_diag_up_t(2, "bilinear", PAD_LANES, PAD_LANES)
    u4n = _block_diag_up_t(4, "nearest", PAD_LANES, PAD_LANES)
    u4b = _block_diag_up_t(4, "bilinear", PAD_LANES, PAD_LANES)
    u8n = _block_diag_up_t(8, "nearest", PAD_LANES, ROWS_FULL)
    u8b = _block_diag_up_t(8, "bilinear", PAD_LANES, ROWS_FULL)

    masks = [_conv_masks_t(2, PAD_LANES, tap_order),
             _conv_masks_t(4, PAD_LANES, tap_order),
             _conv_masks_t(8, PAD_LANES, tap_order),
             _conv_masks_t(16, ROWS_FULL, tap_order)]

    consts = [rw0, rb[0],
              fw[0], fb[0], rw[1], rb[1],
              fw[1], fb[1], rw[2], rb[2],
              fw[2], fb[2], rw[3], rb[3],
              fw[3], fb[3], rw[4], rb[4],
              u1, u2n, u2b, u4n, u4b, u8n, u8b] + masks
    return tuple(jnp.asarray(c) for c in consts)


# ---------------------------------------------------------------------------
# GiraffeGenerator.forward (jit'd; single pallas_call)
# ---------------------------------------------------------------------------
@jax.jit
def giraffe_forward(consts, z):
    """z: (BATCH, inp_dim) latent -> (BATCH, out_dim, img, img) image in [0, 1]."""
    z_t = jnp.zeros((INP_DIM, Z_LANES), jnp.float32)
    z_t = z_t.at[:, :BATCH].set(z.astype(jnp.float32).T)      # channels on sublanes
    out = pl.pallas_call(
        giraffe_kernel,
        out_shape=jax.ShapeDtypeStruct((RGB_PAD, ROWS_FULL), jnp.float32),
        in_specs=_vmem_specs(1 + len(consts)),
        out_specs=pl.BlockSpec(memory_space=VMEM),
        scratch_shapes=[
            pltpu.VMEM((9 * N_FEATURES, ROWS_FULL), jnp.float32),   # im2col scratch (288, 512)
        ],
    )(z_t, *consts)
    img = out[:OUT_DIM].reshape(OUT_DIM, BATCH, IMG_SIZE, IMG_SIZE)
    return jnp.transpose(img, (1, 0, 2, 3))                    # (C,B,H,W) -> NCHW


# ---------------------------------------------------------------------------
# Deterministic parameter init (kaiming-style scale, synthetic; no checkpoint)
# ---------------------------------------------------------------------------
def init_params(key):
    feat_io = [(N_FEATURES, N_FEATURES // 2)] + \
              [(_n_ch(i + 1), _n_ch(i + 2)) for i in range(N_BLOCKS - 1)]
    rgb_in = [N_FEATURES] + [_n_ch(i + 1) for i in range(N_BLOCKS)]
    params = {"feat_w": [], "feat_b": [], "rgb_w": [], "rgb_b": []}
    for cin, cout in feat_io:
        key, k1, k2 = jax.random.split(key, 3)
        std = float(np.sqrt(2.0 / (9 * cin)))
        params["feat_w"].append(jax.random.normal(k1, (3, 3, cin, cout), jnp.float32) * std)
        params["feat_b"].append(jax.random.normal(k2, (cout,), jnp.float32) * 0.05)
    for cin in rgb_in:
        key, k1, k2 = jax.random.split(key, 3)
        std = float(np.sqrt(2.0 / (9 * cin)))
        params["rgb_w"].append(jax.random.normal(k1, (3, 3, cin, OUT_DIM), jnp.float32) * std)
        params["rgb_b"].append(jax.random.normal(k2, (OUT_DIM,), jnp.float32) * 0.05)
    return params


# ---------------------------------------------------------------------------
# Pure-JAX reference (sanity check of the Pallas path)
# ---------------------------------------------------------------------------
def _conv3x3_ref(x, w, b):
    y = jax.lax.conv_general_dilated(
        x, w, window_strides=(1, 1), padding=((1, 1), (1, 1)),
        dimension_numbers=("NHWC", "HWIO", "NHWC"),
        precision=jax.lax.Precision.HIGHEST)
    return y + b.reshape(1, 1, 1, -1)


def _upsample2x_ref(x, mode):
    B, H, W, C = x.shape
    uh = jnp.asarray(_up1d_matrix(H, mode))
    uw = jnp.asarray(_up1d_matrix(W, mode))
    return jnp.einsum("ph,bhwc,qw->bpqc", uh, x, uw,
                      precision=jax.lax.Precision.HIGHEST)


def giraffe_forward_ref(params, z):
    B = z.shape[0]
    net = z.reshape(B, 1, 1, INP_DIM).astype(jnp.float32)
    rgb = _upsample2x_ref(
        _conv3x3_ref(net, params["rgb_w"][0], params["rgb_b"][0]), "bilinear")
    for idx in range(N_BLOCKS):
        net = jax.nn.relu(_conv3x3_ref(_upsample2x_ref(net, "nearest"),
                                       params["feat_w"][idx], params["feat_b"][idx]))
        rgb = rgb + _conv3x3_ref(net, params["rgb_w"][idx + 1], params["rgb_b"][idx + 1])
        if idx < N_BLOCKS - 1:
            rgb = _upsample2x_ref(rgb, "bilinear")
    return jax.nn.sigmoid(jnp.transpose(rgb, (0, 3, 1, 2)))


if __name__ == "__main__":
    key = jax.random.PRNGKey(0)
    kp, kz = jax.random.split(key)
    params = init_params(kp)
    z = jax.random.normal(kz, (BATCH, INP_DIM), jnp.float32)

    roll_matches_jnp = detect_roll_matches_jnp()
    consts = pack_constants(params, roll_matches_jnp)

    out = jax.block_until_ready(giraffe_forward(consts, z))
    assert out.shape == (BATCH, OUT_DIM, IMG_SIZE, IMG_SIZE), out.shape

    ref = jax.block_until_ready(giraffe_forward_ref(params, z))
    max_diff = float(np.max(np.abs(np.asarray(out) - np.asarray(ref))))
    assert max_diff < 1e-2, f"mismatch vs reference: {max_diff}"

    print("KERNEL_OK")
</pallas_src>

<mosaic_0001>
module attributes {stable_mosaic.version = 11 : i64} {
  func.func @_roll_probe_kernel(%arg0: memref<8x128xf32, #tpu.memory_space<vmem>>, %arg1: memref<8x128xf32, #tpu.memory_space<vmem>>) attributes {dimension_semantics = [], scalar_prefetch = 0 : i64, scratch_operands = 0 : i64, tpu.core_type = #tpu.core_type<tc>} {
    %c0 = arith.constant 0 : index
    %c0_0 = arith.constant 0 : index
    %0 = vector.load %arg0[%c0, %c0_0] : memref<8x128xf32, #tpu.memory_space<vmem>>, vector<8x128xf32>
    %c1_i32 = arith.constant 1 : i32
    %1 = tpu.dynamic_rotate %0 by %c1_i32 dim 1 : vector<8x128xf32>, i32 -> vector<8x128xf32>
    %c0_1 = arith.constant 0 : index
    %c0_2 = arith.constant 0 : index
    %2 = vector.load %arg1[%c0_1, %c0_2] : memref<8x128xf32, #tpu.memory_space<vmem>>, vector<8x128xf32>
    tpu.vector_store %arg1[%c0_1, %c0_2], %1 {strides = array<i32>} : memref<8x128xf32, #tpu.memory_space<vmem>>, vector<8x128xf32>,
    return
  }
}

</mosaic_0001>

<bundles_post_ra>
// kernel: tpu_custom_call.1
= control target key start
LH: loop header
LB: loop body
LE: loop exit
PB: predicated region body
PF: predicated region fallthrough
CT: control target
= control target key end

     0   :  { %6 = vsyncpa [#allocation3], 0  ;;  %s106_s0 = inlined_call_operand.hbm [shape: f32[8,128], index: 0, kind: input, shape index: {}]   ;;  %s107_s1 = inlined_call_operand.hbm [shape: f32[8,128], index: 1, kind: output, shape index: {}]  }
   0x1   :  { %7 = vsyncpa [#allocation4], 0  ;;  %s87_s6 = smov [#allocation2]  }
   0x2   :  { %s14_s7 = sshll.u32 %s87_s6, 4  ;;  %s15_s7 = int_to_ptr.vmem [resolvable:$true] %s14_s7 }
   0x3   :  { %s51_s8 = scalar_lea.vmem %s15_s7, 128  ;;  %p56_p1 = scmp.lt.s32.totalorder %s15_s7, %s15_s7 }
   0x4   :  { %p52_p0 = scmp.ne.s32.totalorder %s15_s7, %s51_s8  ;;  %p57_p2 = scmp.lt.s32.totalorder %s51_s8, %s51_s8 }
   0x6   :  { %p58_p3 = por %p57_p2, %p56_p1 }
   0x8   :  { %p59_p4 = pnand %p58_p3, %p52_p0 }
   0xa   :  { %62 = shalt.err (!%p59_p4)
}
   0xb   :  { %17 = dma.hbm_to_vmem [thread:$0]  %s106_s0, 128, %s15_s7, [#allocation3]  }
   0xc   :  { %83 = dma.done.wait [#allocation3], 128  }
   0xd   :  { %84 = vsyncadd [#allocation3], 4294967168  ;;  %v21_v0 = vld [vmem:[#allocation2] sm:$0xff]  ;;  %s88_s11 = smov 1   ;;  %s89_s12 = smov [#allocation5]  }
   0xe   :  { %22 = vrot.lane.b32.xlu0 %v21_v0, %s88_s11  ;;  %s31_s13 = sshll.u32 %s89_s12, 4  ;;  %s32_s13 = int_to_ptr.vmem [resolvable:$true] %s31_s13 }
   0xf   :  { %s63_s14 = scalar_lea.vmem %s32_s13, 128  ;;  %p68_p6 = scmp.lt.s32.totalorder %s32_s13, %s32_s13 }
  0x10   :  { %p64_p5 = scmp.ne.s32.totalorder %s32_s13, %s63_s14  ;;  %p69_p7 = scmp.lt.s32.totalorder %s63_s14, %s63_s14 }
  0x12   :  { %p70_p8 = por %p69_p7, %p68_p6 }
  0x14   :  { %p71_p9 = pnand %p70_p8, %p64_p5 }
  0x80   :  { %v23_v1 = vpop.permute.xlu0 %22 }
  0x81   :  { %24 = vst [vmem:[#allocation5] sm:$0xff] %v23_v1 }
  0x82   :  { %74 = shalt.err (!%p71_p9)
}
  0x83   :  { %34 = dma.vmem_to_hbm [thread:$0]  %s32_s13, 128, %s107_s1, [#allocation4]  }
  0x84   :  { %85 = dma.done.wait [#allocation4], 128  }
  0x85   :  { %86 = vsyncadd [#allocation4], 4294967168 }
  0x86   :  { %38 = vsyncpa [#allocation3], 1 }
  0x87   :  { %39 = vsyncpa [#allocation4], 1 }

</bundles_post_ra>
